<compile_context>
chip_gen: v6e
topology: v6e:2x2x1
jax: 0.10.0
libtpu: 0.0.40
codegen_flags: <defaults>
</compile_context>

<pallas_src>
import functools

import jax
import jax.numpy as jnp
from jax import lax
from jax.experimental import pallas as pl
from jax.experimental.pallas import tpu as pltpu


def _total_loss_kernel(up_ref, ut_ref, ps_ref, mse_ref, gl2_ref, *,
                       inv_eps2, H, tb, batch, ragged):
    """One grid step: `tb` whole samples in natural (tb, 2, H, W) layout."""
    up = up_ref[...].astype(jnp.float32)   # (tb, 2, H, W)
    ut = ut_ref[...].astype(jnp.float32)
    ps = ps_ref[...].astype(jnp.float32)

    # ---- MSE contribution: unscaled sum of squared diffs over channels ----
    diff = up - ut
    per_mse = diff[:, 0] * diff[:, 0] + diff[:, 1] * diff[:, 1]      # (tb, H, W)

    # ---- GL2 contribution ----
    # PyTorch quirk reproduced: the "laplacian" is only d2(u_x)/dH2 + d2(u_y)/dH2.
    # The second derivative is linear, so do the double gradient ONCE on the
    # channel sum (half the rolls / edge selects vs per-channel gradients).
    s = up[:, 0] + up[:, 1]                                          # (tb, H, W)

    rows = lax.broadcasted_iota(jnp.int32, s.shape, 1)
    is_first = rows == 0
    is_last = rows == (H - 1)

    def grad_h(f):
        # torch.gradient along H (sublane axis), unit spacing, edge_order=1.
        fp = jnp.roll(f, -1, axis=1)     # f[i+1] (wrap row overridden below)
        fm = jnp.roll(f, 1, axis=1)      # f[i-1]
        return jnp.where(is_first, fp - f,
                         jnp.where(is_last, f - fm, (fp - fm) * 0.5))

    lap = grad_h(grad_h(s))                                          # (tb, H, W)

    psi_r = ps[:, 0]
    psi_i = ps[:, 1]
    # sqrt removed: |psi|^2 == psi_r^2 + psi_i^2 (sqrt was squared right away)
    factor = inv_eps2 * (1.0 - (psi_r * psi_r + psi_i * psi_i))
    gl2_r = lap + factor * psi_r
    gl2_i = factor * psi_i
    per_gl2 = gl2_r * gl2_r + gl2_i * gl2_i                          # (tb, H, W)

    def _store(mse_val, gl2_val):
        # Batch-only partial reduction (VPU adds); lane-dense (1, H, W) store.
        mse_ref[...] = jnp.sum(mse_val, axis=0, keepdims=True)
        gl2_ref[...] = jnp.sum(gl2_val, axis=0, keepdims=True)

    if ragged:
        # Tail block extends past B: its OOB rows contain garbage (no runtime
        # bounds check on VMEM refs), so gate BOTH contributions before reducing.
        i = pl.program_id(0)
        is_tail = i == pl.num_programs(0) - 1

        @pl.when(is_tail)
        def _():
            bidx = i * tb + lax.broadcasted_iota(jnp.int32, per_mse.shape, 0)
            valid = bidx < batch
            _store(jnp.where(valid, per_mse, 0.0),
                   jnp.where(valid, per_gl2, 0.0))

        @pl.when(jnp.logical_not(is_tail))
        def _():
            _store(per_mse, per_gl2)
    else:
        _store(per_mse, per_gl2)


def _choose_batch_tile(B, C, H, W, itemsize):
    """Samples per grid step: ~2 MiB/input tiles (fits v5e/v6e/v7x scoped VMEM
    with double buffering), but always >= 2 (prefer 4) grid steps when B allows
    it so megacore sharding (v7x) and DMA/compute overlap actually engage."""
    sample_bytes = max(1, C * H * W * itemsize)
    tb = max(1, min(B, (2 << 20) // sample_bytes))
    min_steps = min(B, 4)
    while tb > 1 and pl.cdiv(B, tb) < min_steps:
        tb = (tb + 1) // 2
    return tb


def total_loss(u_pred, u_true, psi_pred, *, lambda_gl2=0.1, epsilon=1.0):
    B, C, H, W = u_pred.shape
    assert C == 2 and u_true.shape == u_pred.shape and psi_pred.shape == u_pred.shape
    # TODO(synk): if H is not a multiple of 8 the sublane rolls lower to masked
    # copies; padding H would change torch.gradient edge semantics, left as-is.
    # TODO(synk): for W far below 128 a (2,H,B*W) relayout would improve lane
    # density, but it costs an extra HBM pass per input; measure before enabling.

    itemsize = jnp.dtype(u_pred.dtype).itemsize
    tb = _choose_batch_tile(B, C, H, W, itemsize)
    grid = (pl.cdiv(B, tb),)
    ragged = (B % tb) != 0

    kernel = functools.partial(
        _total_loss_kernel,
        inv_eps2=1.0 / (float(epsilon) ** 2),
        H=H, tb=tb, batch=B, ragged=ragged,
    )

    in_spec = pl.BlockSpec((tb, C, H, W), lambda i: (i, 0, 0, 0))
    out_spec = pl.BlockSpec((1, H, W), lambda i: (i, 0, 0))

    # VMEM budget: 3 inputs x 2 buffers x tile (+ f32 temporaries) + 2 outputs.
    tile_in = tb * C * H * W * itemsize
    working = 3 * 2 * tile_in + 2 * 2 * H * W * 4
    vmem_limit = int(min(32 << 20, max(16 << 20, 2 * working + (2 << 20))))

    mse_p, gl2_p = pl.pallas_call(
        kernel,
        out_shape=(jax.ShapeDtypeStruct((grid[0], H, W), jnp.float32),
                   jax.ShapeDtypeStruct((grid[0], H, W), jnp.float32)),
        grid=grid,
        in_specs=[in_spec, in_spec, in_spec],
        out_specs=(out_spec, out_spec),
        compiler_params=pltpu.CompilerParams(
            dimension_semantics=("parallel",),
            vmem_limit_bytes=vmem_limit),
    )(u_pred, u_true, psi_pred)

    # Final cross-lane reduce + scaling done once here (not per element):
    #   MSE  = mean over all B*C*H*W elements
    #   GL2  = per-sample mean over H*W, summed over samples, divided by B
    mse = jnp.sum(mse_p) / float(B * C * H * W)
    gl2 = jnp.sum(gl2_p) / float(B * H * W)
    return mse + lambda_gl2 * gl2


# ---------------- pure-JAX reference (mirrors the PyTorch code) ----------------
def _ref_total_loss(u_pred, u_true, psi_pred, lambda_gl2=0.1, epsilon=1.0):
    def grad0(f):
        g = jnp.empty_like(f)
        g = g.at[1:-1].set((f[2:] - f[:-2]) * 0.5)
        g = g.at[0].set(f[1] - f[0])
        g = g.at[-1].set(f[-1] - f[-2])
        return g

    mse = jnp.mean((u_pred - u_true) ** 2)
    B = u_pred.shape[0]
    total = 0.0
    for i in range(B):
        u_x, u_y = u_pred[i, 0], u_pred[i, 1]
        pr, pi = psi_pred[i, 0], psi_pred[i, 1]
        # tuple-concat quirk: only dim=0 second derivatives survive
        lap = grad0(grad0(u_x)) + grad0(grad0(u_y))
        mag = jnp.sqrt(pr ** 2 + pi ** 2)
        fac = (1.0 / epsilon ** 2) * (1.0 - mag ** 2)
        gr = lap + fac * pr
        gi = fac * pi
        total = total + jnp.mean(gr ** 2 + gi ** 2)
    return mse + lambda_gl2 * total / B


if __name__ == "__main__":
    B, C, H, W = 2, 2, 16, 16
    key = jax.random.PRNGKey(0)
    k1, k2, k3 = jax.random.split(key, 3)
    u_pred = jax.random.normal(k1, (B, C, H, W), dtype=jnp.float32)
    u_true = jax.random.normal(k2, (B, C, H, W), dtype=jnp.float32)
    psi_pred = jax.random.normal(k3, (B, C, H, W), dtype=jnp.float32)

    out = total_loss(u_pred, u_true, psi_pred, lambda_gl2=0.1, epsilon=1.0)
    out = jax.block_until_ready(out)

    ref = jax.block_until_ready(_ref_total_loss(u_pred, u_true, psi_pred))
    assert jnp.allclose(out, ref, rtol=1e-5, atol=1e-5), (out, ref)

    print("KERNEL_OK")
</pallas_src>

<mosaic_0001>
module attributes {stable_mosaic.version = 11 : i64} {
  func.func @_total_loss_kernel(%arg0: i32, %arg1: memref<1x2x16x16xf32, #tpu.memory_space<vmem>>, %arg2: memref<1x2x16x16xf32, #tpu.memory_space<vmem>>, %arg3: memref<1x2x16x16xf32, #tpu.memory_space<vmem>>, %arg4: memref<1x16x16xf32, #tpu.memory_space<vmem>>, %arg5: memref<1x16x16xf32, #tpu.memory_space<vmem>>) attributes {dimension_semantics = [#tpu.dimension_semantics<parallel>], iteration_bounds = array<i64: 2>, scalar_prefetch = 0 : i64, scratch_operands = 0 : i64, tpu.core_type = #tpu.core_type<tc>, window_params = [{transform_indices = @transform_0, window_bounds = array<i64: 1, 2, 16, 16>}, {transform_indices = @transform_1, window_bounds = array<i64: 1, 2, 16, 16>}, {transform_indices = @transform_2, window_bounds = array<i64: 1, 2, 16, 16>}, {transform_indices = @transform_3, window_bounds = array<i64: 1, 16, 16>}, {transform_indices = @transform_4, window_bounds = array<i64: 1, 16, 16>}]} {
    %c0 = arith.constant 0 : index
    %c0_0 = arith.constant 0 : index
    %c0_1 = arith.constant 0 : index
    %c0_2 = arith.constant 0 : index
    %0 = vector.load %arg1[%c0, %c0_0, %c0_1, %c0_2] : memref<1x2x16x16xf32, #tpu.memory_space<vmem>>, vector<1x2x16x16xf32>
    %c0_3 = arith.constant 0 : index
    %c0_4 = arith.constant 0 : index
    %c0_5 = arith.constant 0 : index
    %c0_6 = arith.constant 0 : index
    %1 = vector.load %arg2[%c0_3, %c0_4, %c0_5, %c0_6] : memref<1x2x16x16xf32, #tpu.memory_space<vmem>>, vector<1x2x16x16xf32>
    %c0_7 = arith.constant 0 : index
    %c0_8 = arith.constant 0 : index
    %c0_9 = arith.constant 0 : index
    %c0_10 = arith.constant 0 : index
    %2 = vector.load %arg3[%c0_7, %c0_8, %c0_9, %c0_10] : memref<1x2x16x16xf32, #tpu.memory_space<vmem>>, vector<1x2x16x16xf32>
    %3 = arith.subf %0, %1 : vector<1x2x16x16xf32>
    %4 = vector.extract_strided_slice %3 {offsets = [0, 0, 0, 0], sizes = [1, 1, 16, 16], strides = [1, 1, 1, 1]} : vector<1x2x16x16xf32> to vector<1x1x16x16xf32>
    %5 = vector.shape_cast %4 : vector<1x1x16x16xf32> to vector<1x16x16xf32>
    %6 = vector.extract_strided_slice %3 {offsets = [0, 0, 0, 0], sizes = [1, 1, 16, 16], strides = [1, 1, 1, 1]} : vector<1x2x16x16xf32> to vector<1x1x16x16xf32>
    %7 = vector.shape_cast %6 : vector<1x1x16x16xf32> to vector<1x16x16xf32>
    %8 = arith.mulf %5, %7 : vector<1x16x16xf32>
    %9 = vector.extract_strided_slice %3 {offsets = [0, 1, 0, 0], sizes = [1, 1, 16, 16], strides = [1, 1, 1, 1]} : vector<1x2x16x16xf32> to vector<1x1x16x16xf32>
    %10 = vector.shape_cast %9 : vector<1x1x16x16xf32> to vector<1x16x16xf32>
    %11 = vector.extract_strided_slice %3 {offsets = [0, 1, 0, 0], sizes = [1, 1, 16, 16], strides = [1, 1, 1, 1]} : vector<1x2x16x16xf32> to vector<1x1x16x16xf32>
    %12 = vector.shape_cast %11 : vector<1x1x16x16xf32> to vector<1x16x16xf32>
    %13 = arith.mulf %10, %12 : vector<1x16x16xf32>
    %14 = arith.addf %8, %13 : vector<1x16x16xf32>
    %15 = vector.extract_strided_slice %0 {offsets = [0, 0, 0, 0], sizes = [1, 1, 16, 16], strides = [1, 1, 1, 1]} : vector<1x2x16x16xf32> to vector<1x1x16x16xf32>
    %16 = vector.shape_cast %15 : vector<1x1x16x16xf32> to vector<1x16x16xf32>
    %17 = vector.extract_strided_slice %0 {offsets = [0, 1, 0, 0], sizes = [1, 1, 16, 16], strides = [1, 1, 1, 1]} : vector<1x2x16x16xf32> to vector<1x1x16x16xf32>
    %18 = vector.shape_cast %17 : vector<1x1x16x16xf32> to vector<1x16x16xf32>
    %19 = arith.addf %16, %18 : vector<1x16x16xf32>
    %20 = tpu.iota {dimensions = array<i32: 1>} : vector<1x16x16xi32>
    %c0_i32 = arith.constant 0 : i32
    %21 = vector.broadcast %c0_i32 : i32 to vector<1x16x16xi32>
    %22 = arith.cmpi eq, %20, %21 : vector<1x16x16xi32>
    %c15_i32 = arith.constant 15 : i32
    %23 = vector.broadcast %c15_i32 : i32 to vector<1x16x16xi32>
    %24 = arith.cmpi eq, %20, %23 : vector<1x16x16xi32>
    %25 = vector.extract_strided_slice %19 {offsets = [0, 1, 0], sizes = [1, 15, 16], strides = [1, 1, 1]} : vector<1x16x16xf32> to vector<1x15x16xf32>
    %26 = vector.extract_strided_slice %19 {offsets = [0, 0, 0], sizes = [1, 1, 16], strides = [1, 1, 1]} : vector<1x16x16xf32> to vector<1x1x16xf32>
    %27 = tpu.concatenate %25, %26 in 1 : vector<1x15x16xf32>, vector<1x1x16xf32> -> vector<1x16x16xf32>
    %28 = vector.extract_strided_slice %19 {offsets = [0, 15, 0], sizes = [1, 1, 16], strides = [1, 1, 1]} : vector<1x16x16xf32> to vector<1x1x16xf32>
    %29 = vector.extract_strided_slice %19 {offsets = [0, 0, 0], sizes = [1, 15, 16], strides = [1, 1, 1]} : vector<1x16x16xf32> to vector<1x15x16xf32>
    %30 = tpu.concatenate %28, %29 in 1 : vector<1x1x16xf32>, vector<1x15x16xf32> -> vector<1x16x16xf32>
    %31 = arith.subf %27, %19 : vector<1x16x16xf32>
    %32 = arith.subf %19, %30 : vector<1x16x16xf32>
    %33 = arith.subf %27, %30 : vector<1x16x16xf32>
    %cst = arith.constant 5.000000e-01 : f32
    %34 = vector.broadcast %cst : f32 to vector<1x16x16xf32>
    %35 = arith.mulf %33, %34 : vector<1x16x16xf32>
    %36 = arith.select %24, %32, %35 : vector<1x16x16xi1>, vector<1x16x16xf32>
    %37 = arith.select %22, %31, %36 : vector<1x16x16xi1>, vector<1x16x16xf32>
    %38 = vector.extract_strided_slice %37 {offsets = [0, 1, 0], sizes = [1, 15, 16], strides = [1, 1, 1]} : vector<1x16x16xf32> to vector<1x15x16xf32>
    %39 = vector.extract_strided_slice %37 {offsets = [0, 0, 0], sizes = [1, 1, 16], strides = [1, 1, 1]} : vector<1x16x16xf32> to vector<1x1x16xf32>
    %40 = tpu.concatenate %38, %39 in 1 : vector<1x15x16xf32>, vector<1x1x16xf32> -> vector<1x16x16xf32>
    %41 = vector.extract_strided_slice %37 {offsets = [0, 15, 0], sizes = [1, 1, 16], strides = [1, 1, 1]} : vector<1x16x16xf32> to vector<1x1x16xf32>
    %42 = vector.extract_strided_slice %37 {offsets = [0, 0, 0], sizes = [1, 15, 16], strides = [1, 1, 1]} : vector<1x16x16xf32> to vector<1x15x16xf32>
    %43 = tpu.concatenate %41, %42 in 1 : vector<1x1x16xf32>, vector<1x15x16xf32> -> vector<1x16x16xf32>
    %44 = arith.subf %40, %37 : vector<1x16x16xf32>
    %45 = arith.subf %37, %43 : vector<1x16x16xf32>
    %46 = arith.subf %40, %43 : vector<1x16x16xf32>
    %cst_11 = arith.constant 5.000000e-01 : f32
    %47 = vector.broadcast %cst_11 : f32 to vector<1x16x16xf32>
    %48 = arith.mulf %46, %47 : vector<1x16x16xf32>
    %49 = arith.select %24, %45, %48 : vector<1x16x16xi1>, vector<1x16x16xf32>
    %50 = arith.select %22, %44, %49 : vector<1x16x16xi1>, vector<1x16x16xf32>
    %51 = vector.extract_strided_slice %2 {offsets = [0, 0, 0, 0], sizes = [1, 1, 16, 16], strides = [1, 1, 1, 1]} : vector<1x2x16x16xf32> to vector<1x1x16x16xf32>
    %52 = vector.shape_cast %51 : vector<1x1x16x16xf32> to vector<1x16x16xf32>
    %53 = vector.extract_strided_slice %2 {offsets = [0, 1, 0, 0], sizes = [1, 1, 16, 16], strides = [1, 1, 1, 1]} : vector<1x2x16x16xf32> to vector<1x1x16x16xf32>
    %54 = vector.shape_cast %53 : vector<1x1x16x16xf32> to vector<1x16x16xf32>
    %55 = arith.mulf %52, %52 : vector<1x16x16xf32>
    %56 = arith.mulf %54, %54 : vector<1x16x16xf32>
    %57 = arith.addf %55, %56 : vector<1x16x16xf32>
    %cst_12 = arith.constant 1.000000e+00 : f32
    %58 = vector.broadcast %cst_12 : f32 to vector<1x16x16xf32>
    %59 = arith.subf %58, %57 : vector<1x16x16xf32>
    %cst_13 = arith.constant 1.000000e+00 : f32
    %60 = vector.broadcast %cst_13 : f32 to vector<1x16x16xf32>
    %61 = arith.mulf %60, %59 : vector<1x16x16xf32>
    %62 = arith.mulf %61, %52 : vector<1x16x16xf32>
    %63 = arith.addf %50, %62 : vector<1x16x16xf32>
    %64 = arith.mulf %61, %54 : vector<1x16x16xf32>
    %65 = arith.mulf %63, %63 : vector<1x16x16xf32>
    %66 = arith.mulf %64, %64 : vector<1x16x16xf32>
    %67 = arith.addf %65, %66 : vector<1x16x16xf32>
    %cst_14 = arith.constant dense<0.000000e+00> : vector<16x16xf32>
    %68 = vector.multi_reduction <add>, %14, %cst_14 [0] : vector<1x16x16xf32> to vector<16x16xf32>
    %69 = vector.shape_cast %68 : vector<16x16xf32> to vector<1x16x16xf32>
    %c0_15 = arith.constant 0 : index
    %c0_16 = arith.constant 0 : index
    %c0_17 = arith.constant 0 : index
    %70 = vector.load %arg4[%c0_15, %c0_16, %c0_17] : memref<1x16x16xf32, #tpu.memory_space<vmem>>, vector<1x16x16xf32>
    tpu.vector_store %arg4[%c0_15, %c0_16, %c0_17], %69 {strides = array<i32>} : memref<1x16x16xf32, #tpu.memory_space<vmem>>, vector<1x16x16xf32>,
    %cst_18 = arith.constant dense<0.000000e+00> : vector<16x16xf32>
    %71 = vector.multi_reduction <add>, %67, %cst_18 [0] : vector<1x16x16xf32> to vector<16x16xf32>
    %72 = vector.shape_cast %71 : vector<16x16xf32> to vector<1x16x16xf32>
    %c0_19 = arith.constant 0 : index
    %c0_20 = arith.constant 0 : index
    %c0_21 = arith.constant 0 : index
    %73 = vector.load %arg5[%c0_19, %c0_20, %c0_21] : memref<1x16x16xf32, #tpu.memory_space<vmem>>, vector<1x16x16xf32>
    tpu.vector_store %arg5[%c0_19, %c0_20, %c0_21], %72 {strides = array<i32>} : memref<1x16x16xf32, #tpu.memory_space<vmem>>, vector<1x16x16xf32>,
    return
  }
  func.func @transform_0(%arg0: i32) -> (i32, i32, i32, i32) {
    %c0_i32 = arith.constant 0 : i32
    %c0_i32_0 = arith.constant 0 : i32
    %c0_i32_1 = arith.constant 0 : i32
    %c0_i32_2 = arith.constant 0 : i32
    return %arg0, %c0_i32, %c0_i32_0, %c0_i32_1 : i32, i32, i32, i32
  }
  func.func @transform_1(%arg0: i32) -> (i32, i32, i32, i32) {
    %c0_i32 = arith.constant 0 : i32
    %c0_i32_0 = arith.constant 0 : i32
    %c0_i32_1 = arith.constant 0 : i32
    %c0_i32_2 = arith.constant 0 : i32
    return %arg0, %c0_i32, %c0_i32_0, %c0_i32_1 : i32, i32, i32, i32
  }
  func.func @transform_2(%arg0: i32) -> (i32, i32, i32, i32) {
    %c0_i32 = arith.constant 0 : i32
    %c0_i32_0 = arith.constant 0 : i32
    %c0_i32_1 = arith.constant 0 : i32
    %c0_i32_2 = arith.constant 0 : i32
    return %arg0, %c0_i32, %c0_i32_0, %c0_i32_1 : i32, i32, i32, i32
  }
  func.func @transform_3(%arg0: i32) -> (i32, i32, i32) {
    %c0_i32 = arith.constant 0 : i32
    %c0_i32_0 = arith.constant 0 : i32
    %c0_i32_1 = arith.constant 0 : i32
    return %arg0, %c0_i32, %c0_i32_0 : i32, i32, i32
  }
  func.func @transform_4(%arg0: i32) -> (i32, i32, i32) {
    %c0_i32 = arith.constant 0 : i32
    %c0_i32_0 = arith.constant 0 : i32
    %c0_i32_1 = arith.constant 0 : i32
    return %arg0, %c0_i32, %c0_i32_0 : i32, i32, i32
  }
}

</mosaic_0001>

<bundles_post_ra>
// kernel: tpu_custom_call.1
= control target key start
LH: loop header
LB: loop body
LE: loop exit
PB: predicated region body
PF: predicated region fallthrough
CT: control target
= control target key end

     0   :  { %s1261_s0 = inlined_call_operand.hbm [shape: f32[2,2,16,16], index: 0, kind: input, shape index: {}]   ;;  %s1262_s1 = inlined_call_operand.hbm [shape: f32[2,2,16,16], index: 1, kind: input, shape index: {}]   ;;  %s1263_s2 = inlined_call_operand.hbm [shape: f32[2,2,16,16], index: 2, kind: input, shape index: {}]   ;;  %s1264_s3 = inlined_call_operand.hbm [shape: f32[2,16,16], index: 3, kind: output, shape index: {0}]   ;;  %s1265_s4 = inlined_call_operand.hbm [shape: f32[2,16,16], index: 4, kind: output, shape index: {1}]  }
   0x1   :  { %1272 = sst [smem:[#allocation16_spill]] %s1261_s0 }
   0x2   :  { %1273 = sst [smem:[#allocation17_spill]] %s1262_s1 }
   0x3   :  { %10 = vsyncpa [#allocation3], 0 }
   0x4   :  { %12 = vsyncpa [#allocation3 + $0x1], 0 }
   0x5   :  { %13 = vsyncpa [#allocation6], 0 }
   0x6   :  { %15 = vsyncpa [#allocation6 + $0x1], 0 }
   0x7   :  { %16 = vsyncpa [#allocation4], 0 }
   0x8   :  { %18 = vsyncpa [#allocation4 + $0x1], 0 }
   0x9   :  { %19 = vsyncpa [#allocation10], 0 }
   0xa   :  { %21 = vsyncpa [#allocation10 + $0x1], 0  ;;  %s919_s15 = smov 0   ;;  %s921_s16 = smov 0  }
   0xb   :  { %s923_s17 = smov 0   ;;  %s925_s18 = smov 0  }
   0xc LB: > { %s940_s19 = sadd.s32 4294967295, %s883_s18   ;;  %s605_s20 = sadd.s32 4294967294, %s883_s18   ;;  %s883_s18 = sphi %s925_s18, %s1295_s18   ;;  %s879_s17 = sphi %s923_s17, %s1294_s17   ;;  %s875_s16 = sphi %s921_s16, %s1293_s16   ;;  %s871_s15 = sphi %s919_s15, %s1292_s15  }
   0xd   : > { %s944_s21 = sadd.s32 1, %s883_s18   ;;  %s34_s22 = sadd.s32 1, %s879_s17 }
   0xe   : > { %s31_s23 = ssub.s32 %s883_s18, %s944_s21  ;;  %p41_p0 = scmp.ne.s32.totalorder %s879_s17, %s875_s16 }
   0xf   : > { %p32_p1 = scmp.eq.s32.totalorder %s31_s23, 0  ;;  %p42_p2 = scmp.eq.s32.totalorder %s883_s18, 0 }
  0x10   : > { %p47_p3 = scmp.ne.s32.totalorder %s875_s16, %s871_s15  ;;  %p48_p4 = scmp.eq.s32.totalorder %s940_s19, 0 }
  0x11   : > { %s956_s24 = scalar_select %p32_p1, %s879_s17, %s34_s22  }
  0x12   : > { %p43_p5 = por %p42_p2, %p41_p0  ;;  %p958_p6 = por %p48_p4, %p47_p3 }
  0x13   : > { %1274 = sst [smem:[#allocation15_spill]] %s956_s24  ;;  %p123_p7 = scmp.eq.s32.totalorder %s940_s19, 1 }
  0x14   : > { %s1275_s25 = scalar_select %p958_p6, 1, 0 }
  0x15   : > { %p129_p8 = scmp.eq.s32.totalorder %s605_s20, 1  ;;  %p663_p10 = scmp.lt.s32.totalorder %s883_s18, 2 }
  0x16   : > { %p965_p11 = por %p123_p7, %p41_p0  ;;  %s175_s28 = sand.u32 1, %s879_s17  }
  0x17   : > { %p969_p12 = por %p129_p8, %p47_p3  ;;  %s975_s29 = sshll.u32 %s883_s18, 9 }
  0x18   : > { %s1276_s26 = scalar_select %p965_p11, 1, 0 }
  0x19   : > { %s1277_s27 = scalar_select %p969_p12, 1, 0 }
  0x1a   : > { %s979_s30 = sshll.u32 %s175_s28, 5  ;;  %p981_p13 = pnand %p663_p10, %p43_p5 }
  0x1b   : > { %s196_s6 = sand.u32 1, %s883_s18   ;;  %s1279_s1 = sld [smem:[#allocation17_spill]] }
  0x1c   : > { %s200_s10 = scalar_lea.vmem [#allocation5], %s979_s30  ;;  %s996_s12 = scalar_lea.sflag [#allocation6], %s196_s6 }
  0x1d   : > { %s207_s11 = sshll.u32 %s200_s10, 4  ;;  %p1002_p2 = pneg %p981_p13  ;;  %s993_s11 = int_to_ptr.vmem [resolvable:$true] %s207_s11 }
  0x21   : > { %s990_s9 = scalar_lea.hbm %s1279_s1, %s975_s29  ;;  %s706_s23 = scalar_lea.hbm %s1279_s1, 1024 }
  0x22   : > { %s701_s13 = scalar_lea.hbm %s990_s9, 512  ;;  %p707_p5 = scmp.lt.s32.totalorder %s990_s9, %s1279_s1 }
  0x23   : > { %p702_p1 = scmp.ne.s32.totalorder %s990_s9, %s701_s13  ;;  %p708_p7 = scmp.lt.s32.totalorder %s706_s23, %s701_s13 }
  0x25   : > { %p704_p3 = pnand %p1002_p2, %p702_p1  ;;  %p709_p8 = por %p708_p7, %p707_p5 }
  0x27   : > { %p705_p4 = pneg %p704_p3 }
  0x29   : > { %p710_p10 = pnand %p709_p8, %p705_p4 }
  0x2b   : > { %713 = shalt.err (!%p710_p10)
}
  0x2c   : > { %s714_s6 = scalar_lea.vmem %s993_s11, 512  ;;  %s885_s10 = smov [#allocation5]  }
  0x2d   : > { %p715_p9 = scmp.ne.s32.totalorder %s993_s11, %s714_s6  ;;  %s719_s20 = sshll.u32 %s885_s10, 4  ;;  %s720_s20 = int_to_ptr.vmem [resolvable:$false] %s719_s20 }
  0x2e   : > { %s721_s22 = scalar_lea.vmem %s720_s20, 1024  ;;  %p722_p0 = scmp.lt.s32.totalorder %s993_s11, %s720_s20 }
  0x2f   : > { %p717_p1 = pnand %p715_p9, %p1002_p2  ;;  %p723_p12 = scmp.lt.s32.totalorder %s721_s22, %s714_s6 }
  0x31   : > { %p718_p3 = pneg %p717_p1  ;;  %p724_p11 = por %p723_p12, %p722_p0 }
  0x33   : > { %p725_p6 = pnand %p724_p11, %p718_p3 }
  0x35   : > { %728 = shalt.err (!%p725_p6)
}
  0x36   : > { %s1268_s13 = smov 128   ;;  %s1270_s23 = smov 8  }
  0x37   : > { %652 = dma.hbm_to_vmem [thread:$0]  (!%p981_p13), %s990_s9, 512, %s993_s11, %s996_s12, %s1268_s13, %s1268_s13, %s1270_s23  }
  0x38   : > { %p236_p9 = scmp.lt.s32.totalorder %s883_s18, 3  ;;  %s1281_s0 = sld [smem:[#allocation16_spill]] }
  0x39   : > { %p1282_p6 = scmp.ge.s32.totalorder %s883_s18, 1  ;;  %s179_s20 = scalar_lea.vmem [#allocation2], %s979_s30 }
  0x3a   : > { %s186_s22 = sshll.u32 %s179_s20, 4  ;;  %s176_s9 = scalar_lea.sflag [#allocation3], %s175_s28  ;;  %s1042_s22 = int_to_ptr.vmem [resolvable:$true] %s186_s22 }
  0x3b   : > { %p1037_p11 = pnand %p1282_p6, %p236_p9 }
  0x3d   : > { %s1283_s10 = scalar_select %p1037_p11, 1, 0 }
  0x3e   : > { %s1033_s6 = scalar_lea.hbm %s1281_s0, %s975_s29  ;;  %s734_s13 = scalar_lea.hbm %s1281_s0, 1024 }
  0x3f   : > { %s729_s11 = scalar_lea.hbm %s1033_s6, 512  ;;  %p735_p5 = scmp.lt.s32.totalorder %s1033_s6, %s1281_s0 }
  0x40   : > { %p730_p12 = scmp.ne.s32.totalorder %s1033_s6, %s729_s11  ;;  %p736_p7 = scmp.lt.s32.totalorder %s734_s13, %s729_s11 }
  0x42   : > { %p732_p0 = pnand %p730_p12, %p1002_p2  ;;  %p737_p8 = por %p736_p7, %p735_p5 }
  0x44   : > { %p733_p4 = pneg %p732_p0 }
  0x46   : > { %p738_p10 = pnand %p737_p8, %p733_p4 }
  0x48   : > { %741 = shalt.err (!%p738_p10)
}
  0x49   : > { %s742_s28 = scalar_lea.vmem %s1042_s22, 512  ;;  %s888_s20 = smov [#allocation2]  }
  0x4a   : > { %p743_p1 = scmp.ne.s32.totalorder %s1042_s22, %s742_s28  ;;  %s747_s7 = sshll.u32 %s888_s20, 4  ;;  %s748_s7 = int_to_ptr.vmem [resolvable:$false] %s747_s7 }
  0x4b   : > { %s749_s8 = scalar_lea.vmem %s748_s7, 1024  ;;  %p750_p6 = scmp.lt.s32.totalorder %s1042_s22, %s748_s7 }
  0x4c   : > { %p745_p3 = pnand %p743_p1, %p1002_p2  ;;  %p751_p12 = scmp.lt.s32.totalorder %s749_s8, %s742_s28 }
  0x4e   : > { %p746_p9 = pneg %p745_p3  ;;  %p752_p0 = por %p751_p12, %p750_p6 }
  0x50   : > { %p753_p11 = pnand %p752_p0, %p746_p9 }
  0x52   : > { %756 = shalt.err (!%p753_p11)
}
  0x53   : > { %s1284_s1 = smov 8   ;;  %s1285_s13 = smov 128  }
  0x54   : > { %649 = dma.hbm_to_vmem [thread:$0]  (!%p981_p13), %s1033_s6, 512, %s1042_s22, %s176_s9, %s1285_s13, %s1285_s13, %s1284_s1  }
  0x55   : > { %s1073_s20 = scalar_lea.hbm %s1263_s2, %s975_s29  ;;  %s221_s28 = scalar_lea.vmem [#allocation7], %s979_s30 }
  0x56   : > { %s228_s7 = sshll.u32 %s221_s28, 4  ;;  %s757_s8 = scalar_lea.hbm %s1073_s20, 512  ;;  %s229_s7 = int_to_ptr.vmem [resolvable:$true] %s228_s7 }
  0x57   : > { %p758_p11 = scmp.ne.s32.totalorder %s1073_s20, %s757_s8  ;;  %s762_s6 = scalar_lea.hbm %s1263_s2, 1024 }
  0x58   : > { %p763_p7 = scmp.lt.s32.totalorder %s1073_s20, %s1263_s2  ;;  %p764_p8 = scmp.lt.s32.totalorder %s762_s6, %s757_s8 }
  0x59   : > { %p760_p4 = pnand %p758_p11, %p1002_p2 }
  0x5a   : > { %p765_p10 = por %p764_p8, %p763_p7 }
  0x5b   : > { %p761_p5 = pneg %p760_p4 }
  0x5d   : > { %p766_p1 = pnand %p765_p10, %p761_p5 }
  0x5f   : > { %769 = shalt.err (!%p766_p1)
}
  0x60   : > { %s770_s29 = scalar_lea.vmem %s229_s7, 512  ;;  %s889_s30 = smov [#allocation7]  }
  0x61   : > { %p771_p3 = scmp.ne.s32.totalorder %s229_s7, %s770_s29  ;;  %s775_s23 = sshll.u32 %s889_s30, 4  ;;  %s776_s23 = int_to_ptr.vmem [resolvable:$false] %s775_s23 }
  0x62   : > { %s777_s11 = scalar_lea.vmem %s776_s23, 1024  ;;  %p778_p12 = scmp.lt.s32.totalorder %s229_s7, %s776_s23 }
  0x63   : > { %p773_p9 = pnand %p771_p3, %p1002_p2  ;;  %p779_p0 = scmp.lt.s32.totalorder %s777_s11, %s770_s29 }
  0x65   : > { %p774_p6 = pneg %p773_p9  ;;  %p780_p11 = por %p779_p0, %p778_p12 }
  0x67   : > { %p781_p4 = pnand %p780_p11, %p774_p6 }
  0x69   : > { %784 = shalt.err (!%p781_p4)
}
  0x6a   : > { %655 = dma.hbm_to_vmem [thread:$0]  (!%p981_p13), %s1073_s20, 512, %s229_s7, %s996_s12, %s1285_s13, %s1285_s13, %s1284_s1  }
  0x6b   : > { %p1286_p2 = scmp.ne.s32.totalorder %s1283_s10, 0 }
  0x6c   : > { %s1099_s0 = sand.u32 (!%p1286_p2), 1, %s875_s16   ;;  %p1287_p5 = scmp.ne.s32.totalorder (!%p1286_p2), %s1275_s25, 0 }
  0x6d   : > { %240 = sbr.rel (%p1286_p2) target bundleno = 171 (0xab), region = 32  ;;  %s618_s24 = sshll.u32 (!%p1286_p2), %s1099_s0, 5 }
  0x6e   : > { %s243_s14 = scalar_lea.sflag (!%p1286_p2), [#allocation3], %s1099_s0  ;;  %s246_s28 = scalar_lea.vmem (!%p1286_p2), [#allocation2], %s618_s24 }
  0x72   : > { %854 = dma.done.wait (%p1287_p5), %s243_s14, 512  }
  0x73   : > { %856 = vsyncadd (%p1287_p5), %s243_s14, 4294966784  ;;  %s251_s5 = sand.u32 1, %s940_s19   ;;  %s255_s10 = scalar_lea.vmem [#allocation5], %s618_s24 }
  0x74   : > { %s252_s12 = scalar_lea.sflag [#allocation6], %s251_s5 }
  0x75   : > { %858 = dma.done.wait (%p1287_p5), %s252_s12, 1024  }
  0x76   : > { %860 = vsyncadd (%p1287_p5), %s252_s12, 4294966272  ;;  %v328_v0 = vlaneseq  ;;  %s621_s1 = sshll.u32 %s1099_s0, 4  ;;  %v304_v2 = vld [vmem:[%s246_s28] sm:$0xff]  ;;  %v306_v3 = vld [vmem:[%s246_s28 + $0x10] sm:$0xff]  ;;  %vm415_vm0 = vcmask 130048   ;;  %vm337_vm1 = vcmask 1046528  }
  0x77   : > { %v308_v4 = vld [vmem:[%s255_s10] sm:$0xff]  ;;  %v310_v5 = vld [vmem:[%s255_s10 + $0x10] sm:$0xff]  ;;  %v1115_v7 = vadd.f32 %v306_v3, %v304_v2  ;;  %v305_v8 = vld [vmem:[%s246_s28 + $0x8] sm:$0xff]  ;;  %vm347_vm2 = vcmask 1040384   ;;  %s264_s25 = scalar_lea.vmem [#allocation7], %s618_s24  ;;  %s1126_s13 = scalar_lea.vmem [#allocation8], %s621_s1 }
  0x78   : > { %v1113_v1 = vshrl.u32 %v328_v0, 7  ;;  %v316_v6 = vsub.f32 %v304_v2, %v308_v4  ;;  %v307_v9 = vld [vmem:[%s246_s28 + $0x18] sm:$0xff]  ;;  %v318_v10 = vsub.f32 %v306_v3, %v310_v5  ;;  %v309_v11 = vld [vmem:[%s255_s10 + $0x8] sm:$0xff]  ;;  %v1117_v14 = vld [vmem:[%s264_s25] sm:$0xff]  ;;  %s441_s20 = sshll.u32 %s1126_s13, 4  ;;  %s634_s7 = sshll.u32 %s940_s19, 8  ;;  %s1140_s20 = int_to_ptr.vmem [resolvable:$true] %s441_s20 }
  0x79   : > { %v311_v12 = vld [vmem:[%s255_s10 + $0x18] sm:$0xff]  ;;  %v327_v13 = vadd.f32 %v307_v9, %v305_v8  ;;  %v338_v17 = vrot.slane %v1115_v7, 1  ;;  %v348_v18 = vrot.slane %v1115_v7, 7  ;;  %v317_v19 = vsub.f32 %v305_v8, %v309_v11  ;;  %v1129_v20 = vld [vmem:[%s264_s25 + $0x10] sm:$0xff]  ;;  %v1131_v21 = vld [vmem:[%s264_s25 + $0x8] sm:$0xff]  ;;  %s1153_s22 = scalar_lea.hbm %s1264_s3, %s634_s7  ;;  %s423_s9 = scalar_lea.sflag [#allocation4], %s1099_s0 }
  0x7a   : > { %v1120_v15 = vadd.s32 8, %v1113_v1  ;;  %v320_v16 = vmul.f32 %v316_v6, %v316_v6  ;;  %v322_v22 = vmul.f32 %v318_v10, %v318_v10  ;;  %v319_v23 = vsub.f32 %v307_v9, %v311_v12  ;;  %v1144_v34 = vld [vmem:[%s264_s25 + $0x18] sm:$0xff]  ;;  %s785_s29 = scalar_lea.vmem %s1140_s20, 256  ;;  %p1288_p7 = scmp.ne.s32.totalorder %s1276_s26, 0 }
  0x7b   : > { %v339_v24 = vrot.slane %v327_v13, 1  ;;  %v345_v25 = vrot.slane %v327_v13, 7  ;;  %v321_v26 = vmul.f32 %v317_v19, %v317_v19  ;;  %v393_v27 = vmul.f32 %v1117_v14, %v1117_v14  ;;  %p786_p13 = scmp.ne.s32.totalorder %s1140_s20, %s785_s29  ;;  %s890_s30 = smov [#allocation8]  }
  0x7c   : > { %v395_v28 = vmul.f32 %v1129_v20, %v1129_v20  ;;  %v394_v29 = vmul.f32 %v1131_v21, %v1131_v21  ;;  %v324_v30 = vadd.f32 %v322_v22, %v320_v16  ;;  %v323_v31 = vmul.f32 %v319_v23, %v319_v23  ;;  %s789_s23 = sshll.u32 %s890_s30, 4  ;;  %s790_s23 = int_to_ptr.vmem [resolvable:$false] %s789_s23 }
  0x7d   : > { %v344_v32 = vsel %vm337_vm1, %v339_v24, %v338_v17  ;;  %v349_v33 = vsel %vm347_vm2, %v348_v18, %v345_v25  ;;  %v352_v35 = vsel %vm347_vm2, %v345_v25, %v348_v18  ;;  %v340_v38 = vsel %vm337_vm1, %v338_v17, %v339_v24  ;;  %p787_p8 = pnand %p786_p13, %p1288_p7  ;;  %s791_s11 = scalar_lea.vmem %s790_s23, 512 }
  0x7e   : > { %v356_v36 = vsub.f32 %v327_v13, %v349_v33  ;;  %v358_v37 = vsub.f32 %v344_v32, %v349_v33  ;;  %416 = vst.msk [vmem:[%s1126_s13] sm:$0xff] %vm415_vm0, %v324_v30  ;;  %v325_v39 = vadd.f32 %v323_v31, %v321_v26  ;;  %vm334_vm3 = vcmp.eq.s32.totalorder %v1120_v15, 15  ;;  %p792_p1 = scmp.lt.s32.totalorder %s1140_s20, %s790_s23  ;;  %p793_p3 = scmp.lt.s32.totalorder %s791_s11, %s785_s29 }
  0x7f   : > { %v353_v40 = vsub.f32 %v340_v38, %v1115_v7  ;;  %v357_v41 = vsub.f32 %v340_v38, %v352_v35  ;;  %vm331_vm4 = vcmp.eq.s32.totalorder %v1113_v1, 0  ;;  %v397_v43 = vadd.f32 %v395_v28, %v393_v27  ;;  %p788_p10 = pneg %p787_p8 }
  0x80   : > { %v360_v42 = vmul.f32 0.5, %v358_v37  ;;  %v396_v44 = vmul.f32 %v1144_v34, %v1144_v34  ;;  %417 = vst.msk [vmem:[%s1126_s13 + $0x8] sm:$0xff] %vm415_vm0, %v325_v39  ;;  %p794_p9 = por %p793_p3, %p792_p1 }
  0x81   : > { %v359_v45 = vmul.f32 0.5, %v357_v41 }
  0x82   : > { %v362_v46 = vsel %vm334_vm3, %v356_v36, %v360_v42  ;;  %v398_v47 = vadd.f32 %v396_v44, %v394_v29  ;;  %p795_p6 = pnand %p794_p9, %p788_p10 }
  0x84   : > { %798 = shalt.err (!%p795_p6)
}
  0x85   : > { %s799_s24 = scalar_lea.hbm %s1153_s22, 256  ;;  %s803_s5 = scalar_lea.hbm %s1264_s3, 512 }
  0x86   : > { %p800_p12 = scmp.ne.s32.totalorder %s1153_s22, %s799_s24  ;;  %p804_p4 = scmp.lt.s32.totalorder %s1153_s22, %s1264_s3 }
  0x87   : > { %p805_p2 = scmp.lt.s32.totalorder %s803_s5, %s799_s24 }
  0x88   : > { %p801_p0 = pnand %p800_p12, %p1288_p7 }
  0x89   : > { %p806_p5 = por %p805_p2, %p804_p4 }
  0x8a   : > { %p802_p11 = pneg %p801_p0 }
  0x8c   : > { %p807_p13 = pnand %p806_p5, %p802_p11 }
  0x8e   : > { %810 = shalt.err (!%p807_p13)
}
  0x8f   : > { %s891_s25 = smov 128   ;;  %s892_s13 = smov 8   ;;  %v363_v48 = vsel %vm331_vm4, %v353_v40, %v359_v45  ;;  %v368_v49 = vrot.slane %v362_v46, 1  ;;  %v374_v50 = vrot.slane %v362_v46, 7  ;;  %v399_v53 = vsub.f32 1.0, %v397_v43 }
  0x90   : > { %642 = dma.vmem_to_hbm [thread:$0]  (%p1288_p7), %s1140_s20, 256, %s1153_s22, %s423_s9, %s891_s25, %s891_s25, %s892_s13   ;;  %v367_v51 = vrot.slane %v363_v48, 1  ;;  %v376_v52 = vrot.slane %v363_v48, 7  ;;  %v400_v54 = vsub.f32 1.0, %v398_v47 }
  0x91   : > { %v401_v61 = vmul.f32 %v399_v53, %v1117_v14  ;;  %v405_v62 = vmul.f32 %v399_v53, %v1129_v20  ;;  %s303_s20 = scalar_lea.vmem [#allocation9], %s621_s1  ;;  %s1215_s9 = scalar_lea.hbm %s1265_s4, %s634_s7 }
  0x92   : > { %v369_v55 = vsel %vm337_vm1, %v367_v51, %v368_v49  ;;  %v380_v56 = vsel %vm347_vm2, %v374_v50, %v376_v52  ;;  %v373_v57 = vsel %vm337_vm1, %v368_v49, %v367_v51  ;;  %v377_v60 = vsel %vm347_vm2, %v376_v52, %v374_v50  ;;  %s457_s8 = sshll.u32 %s303_s20, 4  ;;  %s428_s1 = scalar_lea.sflag [#allocation10], %s1099_s0  ;;  %s1208_s8 = int_to_ptr.vmem [resolvable:$true] %s457_s8 }
  0x93   : > { %v381_v58 = vsub.f32 %v369_v55, %v363_v48  ;;  %v385_v59 = vsub.f32 %v369_v55, %v380_v56  ;;  %v384_v63 = vsub.f32 %v362_v46, %v377_v60  ;;  %v386_v0 = vsub.f32 %v373_v57, %v377_v60  ;;  %s811_s29 = scalar_lea.vmem %s1208_s8, 256  ;;  %s893_s30 = smov [#allocation9]  }
  0x94   : > { %v402_v3 = vmul.f32 %v400_v54, %v1131_v21  ;;  %v406_v4 = vmul.f32 %v400_v54, %v1144_v34  ;;  %v409_v8 = vmul.f32 %v405_v62, %v405_v62  ;;  %p812_p8 = scmp.ne.s32.totalorder %s1208_s8, %s811_s29  ;;  %s815_s23 = sshll.u32 %s893_s30, 4  ;;  %s816_s23 = int_to_ptr.vmem [resolvable:$false] %s815_s23 }
  0x95   : > { %v387_v2 = vmul.f32 0.5, %v385_v59  ;;  %v388_v5 = vmul.f32 0.5, %v386_v0  ;;  %s817_s11 = scalar_lea.vmem %s816_s23, 512  ;;  %p818_p3 = scmp.lt.s32.totalorder %s1208_s8, %s816_s23 }
  0x96   : > { %v410_v11 = vmul.f32 %v406_v4, %v406_v4  ;;  %p813_p10 = pnand %p812_p8, %p1288_p7  ;;  %p819_p9 = scmp.lt.s32.totalorder %s817_s11, %s811_s29 }
  0x97   : > { %v391_v6 = vsel %vm331_vm4, %v381_v58, %v387_v2  ;;  %v390_v9 = vsel %vm334_vm3, %v384_v63, %v388_v5 }
  0x98   : > { %v403_v7 = vadd.f32 %v401_v61, %v391_v6  ;;  %v404_v10 = vadd.f32 %v402_v3, %v390_v9  ;;  %p814_p1 = pneg %p813_p10  ;;  %p820_p6 = por %p819_p9, %p818_p3 }
  0x9a   : > { %v407_v12 = vmul.f32 %v403_v7, %v403_v7  ;;  %v408_v13 = vmul.f32 %v404_v10, %v404_v10  ;;  %p821_p12 = pnand %p820_p6, %p814_p1 }
  0x9c   : > { %v411_v14 = vadd.f32 %v409_v8, %v407_v12  ;;  %v412_v1 = vadd.f32 %v410_v11, %v408_v13 }
  0x9e   : > { %420 = vst.msk [vmem:[%s303_s20] sm:$0xff] %vm415_vm0, %v411_v14  ;;  %421 = vst.msk [vmem:[%s303_s20 + $0x8] sm:$0xff] %vm415_vm0, %v412_v1 }
  0x9f   : > { %824 = shalt.err (!%p821_p12)
}
  0xa0   : > { %s825_s19 = scalar_lea.hbm %s1215_s9, 256  ;;  %s829_s24 = scalar_lea.hbm %s1265_s4, 512 }
  0xa1   : > { %p826_p0 = scmp.ne.s32.totalorder %s1215_s9, %s825_s19  ;;  %p830_p2 = scmp.lt.s32.totalorder %s1215_s9, %s1265_s4 }
  0xa2   : > { %p831_p5 = scmp.lt.s32.totalorder %s829_s24, %s825_s19 }
  0xa3   : > { %p827_p11 = pnand %p826_p0, %p1288_p7 }
  0xa4   : > { %p832_p13 = por %p831_p5, %p830_p2 }
  0xa5   : > { %p828_p4 = pneg %p827_p11 }
  0xa7   : > { %p833_p8 = pnand %p832_p13, %p828_p4 }
  0xa9   : > { %836 = shalt.err (!%p833_p8)
}
  0xaa   : > { %643 = dma.vmem_to_hbm [thread:$0]  (%p1288_p7), %s1208_s8, 256, %s1215_s9, %s428_s1, %s891_s25, %s891_s25, %s892_s13  }
  0xab PF: > { %s472_s5 = sand.u32 1, %s871_s15   ;;  %p1289_p10 = scmp.ne.s32.totalorder %s1277_s27, 0 }
  0xac   : > { %p1290_p1 = scmp.ge.s32.totalorder %s883_s18, 2  ;;  %s473_s12 = scalar_lea.sflag [#allocation4], %s472_s5 }
  0xae   : > { %p657_p3 = pnand %p1290_p1, %p1289_p10 }
  0xb0   : > { %p658_p9 = pneg %p657_p3 }
  0xb2   : > { %862 = dma.done.wait (%p658_p9), %s473_s12, 256  }
  0xb3   : > { %864 = vsyncadd (%p658_p9), %s473_s12, 4294967040  ;;  %s482_s10 = scalar_lea.sflag [#allocation10], %s472_s5 }
  0xb4   : > { %866 = dma.done.wait (%p658_p9), %s482_s10, 256  }
  0xb5   : > { %868 = vsyncadd (%p658_p9), %s482_s10, 4294967040  ;;  %s1291_s26 = sld [smem:[#allocation15_spill]]  ;;  %p24_p7 = scmp.ge.s32.totalorder %s944_s21, 4  }
  0xb6   : > { %s1292_s15 = smov %s875_s16  ;;  %s1293_s16 = smov %s879_s17 }
  0xb7   : > { %s1295_s18 = smov %s944_s21  ;;  %26 = sbr.rel (!%p24_p7) target bundleno = 12 (0xc), region = 118 }
  0xbb   : > { %s1294_s17 = smov %s1291_s26 }
  0xbc   :  { %487 = vsyncpa [#allocation3], 1 }
  0xbd   :  { %489 = vsyncpa [#allocation3 + $0x1], 1 }
  0xbe   :  { %490 = vsyncpa [#allocation6], 1 }
  0xbf   :  { %492 = vsyncpa [#allocation6 + $0x1], 1 }
  0xc0   :  { %493 = vsyncpa [#allocation4], 1 }
  0xc1   :  { %495 = vsyncpa [#allocation4 + $0x1], 1 }
  0xc2   :  { %496 = vsyncpa [#allocation10], 1 }
  0xc3   :  { %498 = vsyncpa [#allocation10 + $0x1], 1 }

</bundles_post_ra>
